<compile_context>
chip_gen: v7x
topology: tpu7x:2x2x1
jax: 0.10.0
libtpu: 0.0.40
codegen_flags: <defaults>
</compile_context>

<pallas_src>
import math

import jax
import jax.numpy as jnp
from jax.experimental import pallas as pl
from jax.experimental.pallas import tpu as pltpu

K_PARTICLES = 5
REINFORCE_WEIGHT = 0.0  # matches module __init__: self.reinforce_weight = 0.0


# --------------------------------------------------------------------------
# Fused kernel: D-tiled surrogate matmul  ->  VMEM accumulator  ->  VIMCO loss
# --------------------------------------------------------------------------
def _fused_sqair_vimco_kernel(x_ref, w_ref, blw_ref, bzp_ref, loss_ref, acc_ref):
    d = pl.program_id(0)

    @pl.when(d == 0)
    def _init():
        acc_ref[...] = jnp.zeros_like(acc_ref)

    # (B, tk) @ (tk, 2) accumulated in f32; bf16 inputs feed the MXU natively.
    acc_ref[...] += jnp.dot(
        x_ref[...], w_ref[...], preferred_element_type=jnp.float32
    )

    @pl.when(d == pl.num_programs(0) - 1)
    def _epilogue():
        bb, kk = blw_ref.shape
        log_k = jnp.float32(math.log(kk))

        # per-particle log weights: shared matmul column 0 + per-(b,k) bias
        lw = acc_ref[:, 0:1] + blw_ref[...].astype(jnp.float32)          # (B, K)

        # iwae_term = logsumexp(log_weights, dim=1) - log K
        m = jnp.max(lw, axis=1, keepdims=True)                           # (B, 1)
        iwae = jnp.log(jnp.sum(jnp.exp(lw - m), axis=1, keepdims=True)) + m - log_k

        loss_per_b = -iwae                                               # (B, 1)

        # REINFORCE term is weighted by a compile-time constant 0.0 in the
        # reference module -> elide the whole control-variate loop at trace
        # time.  Kept (guarded) for generality if the weight is made nonzero.
        if REINFORCE_WEIGHT != 0.0:
            zp = acc_ref[:, 1:2] + bzp_ref[...].astype(jnp.float32)      # (B, K)
            lw_sum = jnp.sum(lw, axis=1, keepdims=True)                  # (B, 1)
            lw_est = (lw_sum - lw) / jnp.float32(kk - 1.0)               # (B, K)
            col = jax.lax.broadcasted_iota(jnp.int32, lw.shape, 1)       # (B, K)
            reinforce = jnp.zeros((bb, 1), dtype=jnp.float32)
            for j in range(kk):  # K small & static -> unrolled at trace time
                vals = jnp.where(col == j, lw_est, lw)                   # (B, K)
                mj = jnp.max(vals, axis=1, keepdims=True)
                cv_j = (
                    jnp.log(jnp.sum(jnp.exp(vals - mj), axis=1, keepdims=True))
                    + mj
                    - log_k
                )
                reinforce = reinforce + (lw[:, j : j + 1] - cv_j) * zp[:, j : j + 1]
            loss_per_b = loss_per_b - jnp.float32(REINFORCE_WEIGHT) * reinforce

        loss_ref[...] = jnp.mean(loss_per_b, axis=0, keepdims=True)      # (1, 1)


def fused_sqair_vimco(x_flat, w, bias_lw, bias_zp, *, tk=None):
    """x_flat: (B, D) bf16/f32, w: (D, 2), bias_*: (B, K) f32 -> scalar loss."""
    b, d = x_flat.shape
    k = bias_lw.shape[1]
    if tk is None:
        # D-tile: big enough to stay near HBM roofline, small enough for
        # double-buffered VMEM on all generations (incl. v7x's 64 MiB).
        tk = 512 if (d % 512 == 0 and d > 512) else d
    assert d % tk == 0, (d, tk)
    n_steps = d // tk

    out = pl.pallas_call(
        _fused_sqair_vimco_kernel,
        out_shape=jax.ShapeDtypeStruct((1, 1), jnp.float32),
        grid_spec=pltpu.PrefetchScalarGridSpec(
            num_scalar_prefetch=0,
            grid=(n_steps,),
            in_specs=[
                pl.BlockSpec((b, tk), lambda i: (0, i)),   # x tile (streams over D)
                pl.BlockSpec((tk, 2), lambda i: (i, 0)),   # matching w tile
                pl.BlockSpec((b, k), lambda i: (0, 0)),    # bias_lw (DMA'd once)
                pl.BlockSpec((b, k), lambda i: (0, 0)),    # bias_zp (DMA'd once)
            ],
            out_specs=pl.BlockSpec((1, 1), lambda i: (0, 0)),
            scratch_shapes=[pltpu.VMEM((b, 2), jnp.float32)],
        ),
        compiler_params=pltpu.CompilerParams(
            dimension_semantics=("arbitrary",),  # D is a reduction axis
        ),
    )(x_flat, w, bias_lw, bias_zp)
    return out[0, 0]


# --------------------------------------------------------------------------
# Full forward (glue reshapes in plain JAX, all compute in the fused kernel).
# --------------------------------------------------------------------------
def sqair_vimco_forward(x, w, bias, k=K_PARTICLES):
    t, b, c, h, w_ = x.shape
    d = t * c * h * w_

    # x[:, :, None].expand(T,B,K,C,H,W).view(T,B*K,C,H,W) is K identical copies
    # per batch element for the linear surrogate -> skip the expansion and run
    # the matmul on (B, D); the per-particle variation lives in the bias.
    x_flat = jnp.transpose(x, (1, 0, 2, 3, 4)).reshape(b, d)

    bias_lw = bias[:, 0].reshape(b, k).astype(jnp.float32)
    bias_zp = bias[:, 1].reshape(b, k).astype(jnp.float32)

    return fused_sqair_vimco(
        x_flat.astype(jnp.bfloat16),
        w.astype(jnp.bfloat16),
        bias_lw,
        bias_zp,
    )


# --------------------------------------------------------------------------
# Pure-JAX reference (mirrors the PyTorch math, including the explicit
# K-expansion and the diag_embed control variate) for a correctness check.
# --------------------------------------------------------------------------
def _reference_loss(x, w, bias, k):
    t, b, c, h, w_ = x.shape
    x_exp = jnp.broadcast_to(x[:, :, None], (t, b, k, c, h, w_)).reshape(
        t, b * k, c, h, w_
    )
    x_flat = jnp.transpose(x_exp, (1, 0, 2, 3, 4)).reshape(b * k, -1)
    out = jnp.dot(x_flat, w, precision=jax.lax.Precision.HIGHEST) + bias
    lw = out[:, 0].reshape(b, k)
    zp = out[:, 1].reshape(b, k)

    iwae = jax.scipy.special.logsumexp(lw, axis=1) - math.log(k)
    lw_sum = lw.sum(axis=1, keepdims=True)
    lw_est = (lw_sum - lw) / (k - 1.0)
    mat = jnp.broadcast_to(lw[:, :, None], (b, k, k))
    estimate = mat + jnp.eye(k, dtype=lw.dtype)[None] * (lw_est - lw)[:, :, None]
    cv = jax.scipy.special.logsumexp(estimate, axis=-2) - math.log(k)
    reinforce = ((lw - cv) * zp).sum(axis=1)
    return jnp.mean(-iwae - REINFORCE_WEIGHT * reinforce)


if __name__ == "__main__":
    T, B, C, H, W = 4, 2, 1, 16, 16
    K = K_PARTICLES
    D = T * C * H * W

    key = jax.random.PRNGKey(0)
    x = jax.random.normal(key, (T, B, C, H, W), dtype=jnp.float32)

    # Deterministic surrogate parameters (no checkpoint loading).
    w = jnp.sin(jnp.arange(D * 2, dtype=jnp.float32)).reshape(D, 2) / jnp.float32(D)
    bias = 0.1 * jnp.cos(jnp.arange(B * K * 2, dtype=jnp.float32)).reshape(B * K, 2)

    loss = jax.block_until_ready(sqair_vimco_forward(x, w, bias, K))
    ref = jax.block_until_ready(_reference_loss(x, w, bias, K))

    assert jnp.isfinite(loss), "non-finite loss"
    assert abs(float(loss) - float(ref)) < 2e-3, (float(loss), float(ref))

    print("KERNEL_OK")
</pallas_src>

<mosaic_0001>
module attributes {stable_mosaic.version = 11 : i64} {
  func.func @_fused_sqair_vimco_kernel(%arg0: i32, %arg1: memref<2x512xbf16, #tpu.memory_space<vmem>>, %arg2: memref<512x2xbf16, #tpu.memory_space<vmem>>, %arg3: memref<2x5xf32, #tpu.memory_space<vmem>>, %arg4: memref<2x5xf32, #tpu.memory_space<vmem>>, %arg5: memref<1x1xf32, #tpu.memory_space<vmem>>, %arg6: memref<2x2xf32, #tpu.memory_space<vmem>>) attributes {dimension_semantics = [#tpu.dimension_semantics<arbitrary>], iteration_bounds = array<i64: 2>, scalar_prefetch = 0 : i64, scratch_operands = 1 : i64, tpu.core_type = #tpu.core_type<tc>, window_params = [{transform_indices = @transform_0, window_bounds = array<i64: 2, 512>}, {transform_indices = @transform_1, window_bounds = array<i64: 512, 2>}, {pipeline_mode = #tpu.pipeline_mode<synchronous>, transform_indices = @transform_2, window_bounds = array<i64: 2, 5>}, {pipeline_mode = #tpu.pipeline_mode<synchronous>, transform_indices = @transform_3, window_bounds = array<i64: 2, 5>}, {pipeline_mode = #tpu.pipeline_mode<synchronous>, transform_indices = @transform_4, window_bounds = array<i64: 1, 1>}]} {
    %c0_i32 = arith.constant 0 : i32
    %0 = arith.cmpi eq, %arg0, %c0_i32 : i32
    %1 = arith.extui %0 : i1 to i32
    %c0_i32_0 = arith.constant 0 : i32
    %2 = arith.cmpi ne, %1, %c0_i32_0 : i32
    scf.if %2 {
      %cst_9 = arith.constant 0.000000e+00 : f32
      %12 = vector.broadcast %cst_9 : f32 to vector<2x2xf32>
      %c0_10 = arith.constant 0 : index
      %c0_11 = arith.constant 0 : index
      %13 = vector.load %arg6[%c0_10, %c0_11] : memref<2x2xf32, #tpu.memory_space<vmem>>, vector<2x2xf32>
      tpu.vector_store %arg6[%c0_10, %c0_11], %12 {strides = array<i32>} : memref<2x2xf32, #tpu.memory_space<vmem>>, vector<2x2xf32>,
    } else {
    }
    %c0 = arith.constant 0 : index
    %c0_1 = arith.constant 0 : index
    %3 = vector.load %arg6[%c0, %c0_1] : memref<2x2xf32, #tpu.memory_space<vmem>>, vector<2x2xf32>
    %c0_2 = arith.constant 0 : index
    %c0_3 = arith.constant 0 : index
    %4 = vector.load %arg1[%c0_2, %c0_3] : memref<2x512xbf16, #tpu.memory_space<vmem>>, vector<2x512xbf16>
    %c0_4 = arith.constant 0 : index
    %c0_5 = arith.constant 0 : index
    %5 = vector.load %arg2[%c0_4, %c0_5] : memref<512x2xbf16, #tpu.memory_space<vmem>>, vector<512x2xbf16>
    %cst = arith.constant dense<0.000000e+00> : vector<2x2xf32>
    %6 = tpu.matmul %4, %5, %cst {dimension_numbers = #tpu.dot_dimension_numbers<[1], [0], [0], [1], [0, 0, 1, 1], [], []>} : vector<2x512xbf16>, vector<512x2xbf16>, vector<2x2xf32> -> vector<2x2xf32>
    %7 = arith.addf %3, %6 : vector<2x2xf32>
    %c0_6 = arith.constant 0 : index
    %c0_7 = arith.constant 0 : index
    %8 = vector.load %arg6[%c0_6, %c0_7] : memref<2x2xf32, #tpu.memory_space<vmem>>, vector<2x2xf32>
    tpu.vector_store %arg6[%c0_6, %c0_7], %7 {strides = array<i32>} : memref<2x2xf32, #tpu.memory_space<vmem>>, vector<2x2xf32>,
    %c1_i32 = arith.constant 1 : i32
    %9 = arith.cmpi eq, %arg0, %c1_i32 : i32
    %10 = arith.extui %9 : i1 to i32
    %c0_i32_8 = arith.constant 0 : i32
    %11 = arith.cmpi ne, %10, %c0_i32_8 : i32
    scf.if %11 {
      %c0_9 = arith.constant 0 : index
      %c0_10 = arith.constant 0 : index
      %12 = vector.load %arg6[%c0_9, %c0_10] : memref<2x2xf32, #tpu.memory_space<vmem>>, vector<2x1xf32>
      %c0_11 = arith.constant 0 : index
      %c0_12 = arith.constant 0 : index
      %13 = vector.load %arg3[%c0_11, %c0_12] : memref<2x5xf32, #tpu.memory_space<vmem>>, vector<2x5xf32>
      %14 = vector.broadcast %12 : vector<2x1xf32> to vector<2x5xf32>
      %15 = arith.addf %14, %13 : vector<2x5xf32>
      %cst_13 = arith.constant dense<0xFF800000> : vector<2xf32>
      %16 = vector.multi_reduction <maximumf>, %15, %cst_13 [1] : vector<2x5xf32> to vector<2xf32>
      %17 = vector.shape_cast %16 : vector<2xf32> to vector<2x1xf32>
      %18 = vector.broadcast %17 : vector<2x1xf32> to vector<2x5xf32>
      %19 = arith.subf %15, %18 : vector<2x5xf32>
      %20 = math.exp %19 : vector<2x5xf32>
      %cst_14 = arith.constant dense<0.000000e+00> : vector<2xf32>
      %21 = vector.multi_reduction <add>, %20, %cst_14 [1] : vector<2x5xf32> to vector<2xf32>
      %22 = vector.shape_cast %21 : vector<2xf32> to vector<2x1xf32>
      %23 = math.log %22 : vector<2x1xf32>
      %24 = arith.addf %23, %17 : vector<2x1xf32>
      %cst_15 = arith.constant 1.60943794 : f32
      %25 = vector.broadcast %cst_15 : f32 to vector<2x1xf32>
      %26 = arith.subf %24, %25 : vector<2x1xf32>
      %cst_16 = arith.constant 0.000000e+00 : f32
      %27 = vector.broadcast %cst_16 : f32 to vector<2x1xf32>
      %28 = arith.subf %27, %26 : vector<2x1xf32>
      %cst_17 = arith.constant dense<0.000000e+00> : vector<1xf32>
      %29 = vector.multi_reduction <add>, %28, %cst_17 [0] : vector<2x1xf32> to vector<1xf32>
      %30 = vector.shape_cast %29 : vector<1xf32> to vector<1x1xf32>
      %cst_18 = arith.constant 2.000000e+00 : f32
      %31 = vector.broadcast %cst_18 : f32 to vector<1x1xf32>
      %32 = arith.divf %30, %31 : vector<1x1xf32>
      %c0_19 = arith.constant 0 : index
      %c0_20 = arith.constant 0 : index
      %33 = vector.load %arg5[%c0_19, %c0_20] : memref<1x1xf32, #tpu.memory_space<vmem>>, vector<1x1xf32>
      tpu.vector_store %arg5[%c0_19, %c0_20], %32 {strides = array<i32>} : memref<1x1xf32, #tpu.memory_space<vmem>>, vector<1x1xf32>,
    } else {
    }
    return
  }
  func.func @transform_0(%arg0: i32) -> (i32, i32) {
    %c0_i32 = arith.constant 0 : i32
    %c0_i32_0 = arith.constant 0 : i32
    return %c0_i32, %arg0 : i32, i32
  }
  func.func @transform_1(%arg0: i32) -> (i32, i32) {
    %c0_i32 = arith.constant 0 : i32
    %c0_i32_0 = arith.constant 0 : i32
    return %arg0, %c0_i32 : i32, i32
  }
  func.func @transform_2(%arg0: i32) -> (i32, i32) {
    %c0_i32 = arith.constant 0 : i32
    %c0_i32_0 = arith.constant 0 : i32
    %c0_i32_1 = arith.constant 0 : i32
    return %c0_i32, %c0_i32_0 : i32, i32
  }
  func.func @transform_3(%arg0: i32) -> (i32, i32) {
    %c0_i32 = arith.constant 0 : i32
    %c0_i32_0 = arith.constant 0 : i32
    %c0_i32_1 = arith.constant 0 : i32
    return %c0_i32, %c0_i32_0 : i32, i32
  }
  func.func @transform_4(%arg0: i32) -> (i32, i32) {
    %c0_i32 = arith.constant 0 : i32
    %c0_i32_0 = arith.constant 0 : i32
    %c0_i32_1 = arith.constant 0 : i32
    return %c0_i32, %c0_i32_0 : i32, i32
  }
}

</mosaic_0001>

<bundles_post_ra>
// kernel: tpu_custom_call.1
= control target key start
LH: loop header
LB: loop body
LE: loop exit
PB: predicated region body
PF: predicated region fallthrough
CT: control target
= control target key end

     0   :  { %9 = vsyncpa [#allocation4], 0  ;;  %s889_s15 = smov 0   ;;  %s980_s0 = inlined_call_operand.vmem [shape: bf16[2,1024], index: 0, kind: input, shape index: {}]   ;;  %s981_s1 = inlined_call_operand.vmem [shape: bf16[1024,2], index: 1, kind: input, shape index: {}]   ;;  %s982_s2 = inlined_call_operand.vmem [shape: f32[2,5], index: 2, kind: input, shape index: {}]   ;;  %s983_s3 = inlined_call_operand.vmem [shape: f32[2,5], index: 3, kind: input, shape index: {}]   ;;  %s984_s4 = inlined_call_operand.hbm [shape: f32[1,1], index: 4, kind: output, shape index: {}]  }
   0x1 LB: > { %s895_s16 = sadd.s32 4294967295, %s858_s15   ;;  %p679_p0 = scmp.ge.s32.totalorder %s858_s15, 1  ;;  %s858_s15 = sphi %s889_s15, %s15_s15  }
   0x2   : > { %p169_p1 = scmp.lt.s32.totalorder %s858_s15, 3 }
   0x4   : > { %p170_p2 = pnand %p679_p0, %p169_p1 }
   0x5   : > { %s680_s3 = sshll.u32 (!%p170_p2), %s895_s16, 2  ;;  %s681_s17 = sshll.u32 (!%p170_p2), %s895_s16, 6 }
   0x6   : > { %173 = sbr.rel (%p170_p2) target bundleno = 775 (0x307), region = 36  ;;  %p195_p3 = scmp.lt.s32.totalorder (!%p170_p2), %s680_s3, 7 }
   0x7   : > { %p200_p4 = scmp.lt.s32.totalorder (!%p170_p2), %s681_s17, 127  ;;  %p683_p5 = scmp.ne.s32.totalorder (!%p170_p2), %s895_s16, 0 }
   0xd   : > { %s986_s3 = smov (!%p195_p3, %s680_s3), 7  ;;  %s988_s17 = smov (!%p200_p4, %s681_s17), 127 }
   0xe   : > { %s197_s20 = scalar_lea.vmem %s980_s0, %s986_s3  ;;  %s682_s21 = sshll.u32 %s988_s17, 2  ;;  %vm210_vm0 = vcmask (!%p683_p5), 9216   ;;  %v860_v0 = vmov (!%p683_p5), 0.0  }
   0xf   : > { %s910_s24 = scalar_lea.vmem %s981_s1, %s682_s21  ;;  %209 = sbr.rel (%p683_p5) target bundleno = 22 (0x16), region = 40  ;;  %211 = vst.msk [vmem:[#allocation2] sm:$0x3] (!%p683_p5), %vm210_vm0, %v860_v0 }
  0x16 PF: > { %v785_v1 = vld [vmem:[%s910_s24 + $0x40] sm:$0xff]   ;;  %v789_v5 = vld [vmem:[%s910_s24 + $0x48] sm:$0xff]   ;;  %v793_v9 = vld [vmem:[%s910_s24 + $0x50] sm:$0xff]   ;;  %v290_v31 = vlaneseq  ;;  %v861_v35 = vmov 1966171168   ;;  %vm580_vm1 = vcmask 9216  }
  0x17   : > { %v786_v2 = vld [vmem:[%s910_s24 + $0xc0] sm:$0xff]   ;;  %723 = vmatprep.subr.bf16.mxu0 %v785_v1  ;;  %v790_v6 = vld [vmem:[%s910_s24 + $0xc8] sm:$0xff]   ;;  %v794_v10 = vld [vmem:[%s910_s24 + $0xd0] sm:$0xff]   ;;  %v288_v36 = vunpack.c.l.s4 %v861_v35  ;;  %p717_p6 = scmp.ne.s32.totalorder %s895_s16, 1 }
  0x18   : > { %v787_v3 = vld [vmem:[%s910_s24] sm:$0xff]   ;;  %745 = vmatprep.subr.bf16.mxu1 %v786_v2  ;;  %v791_v7 = vld [vmem:[%s910_s24 + $0x8] sm:$0xff]   ;;  %v795_v11 = vld [vmem:[%s910_s24 + $0x10] sm:$0xff]   ;;  %v291_v37 = vshrl.u32 %v290_v31, 7  ;;  %v862_v59 = vmov (!%p717_p6), 0   ;;  %vm594_vm2 = vcmask (!%p717_p6), 33792  }
  0x19   : > { %v788_v4 = vld [vmem:[%s910_s24 + $0x80] sm:$0xff]   ;;  %724 = vmatpush3.bf16.msra.mxu0 %v787_v3  ;;  %v792_v8 = vld [vmem:[%s910_s24 + $0x88] sm:$0xff]   ;;  %v796_v12 = vld [vmem:[%s910_s24 + $0x90] sm:$0xff]   ;;  %v289_v39 = vunpack.c.0.s8 %v288_v36  ;;  %817 = vset.pattern.permute.xlu0 (!%p717_p6), %v862_v59  ;;  %vm609_vm3 = vcmask (!%p717_p6), 1041408   ;;  %vm619_vm4 = vcmask (!%p717_p6), 0  }
  0x1a   : > { %746 = vmatpush3.bf16.msra.mxu1 %v788_v4  ;;  %725 = vmatprep.subr.bf16.mxu0 %v789_v5  ;;  %v797_v13 = vld [vmem:[%s910_s24 + $0x58] sm:$0xff]   ;;  %v801_v17 = vld [vmem:[%s910_s24 + $0x60] sm:$0xff]   ;;  %v805_v21 = vld [vmem:[%s910_s24 + $0x68] sm:$0xff]  }
  0x1b   : > { %747 = vmatprep.subr.bf16.mxu1 %v790_v6  ;;  %v798_v14 = vld [vmem:[%s910_s24 + $0xd8] sm:$0xff]   ;;  %v802_v18 = vld [vmem:[%s910_s24 + $0xe0] sm:$0xff]   ;;  %v806_v22 = vld [vmem:[%s910_s24 + $0xe8] sm:$0xff]   ;;  %v292_v40 = vsub.s32 %v289_v39, %v291_v37 }
  0x1c   : > { %v799_v15 = vld [vmem:[%s910_s24 + $0x18] sm:$0xff]   ;;  %v803_v19 = vld [vmem:[%s910_s24 + $0x20] sm:$0xff]   ;;  %v807_v23 = vld [vmem:[%s910_s24 + $0x28] sm:$0xff]  }
  0x1d   : > { %726 = vmatpush3.bf16.msra.mxu0 %v791_v7  ;;  %v800_v16 = vld [vmem:[%s910_s24 + $0x98] sm:$0xff]   ;;  %v804_v20 = vld [vmem:[%s910_s24 + $0xa0] sm:$0xff]   ;;  %v808_v24 = vld [vmem:[%s910_s24 + $0xa8] sm:$0xff]  }
  0x1e   : > { %748 = vmatpush3.bf16.msra.mxu1 %v792_v8  ;;  %727 = vmatprep.subr.bf16.mxu0 %v793_v9  ;;  %v809_v25 = vld [vmem:[%s910_s24 + $0x70] sm:$0xff]   ;;  %v813_v29 = vld [vmem:[%s910_s24 + $0x78] sm:$0xff]   ;;  %v684_v34 = vld.sshfl [vmem:[%s197_s20] sm:$0x33 pattern:$0x75316420] }
  0x1f   : > { %749 = vmatprep.subr.bf16.mxu1 %v794_v10  ;;  %v810_v26 = vld [vmem:[%s910_s24 + $0xf0] sm:$0xff]   ;;  %v814_v30 = vld [vmem:[%s910_s24 + $0xf8] sm:$0xff]   ;;  %v286_v38 = vcombine.high %v684_v34, %v684_v34  ;;  %v293_v42 = vrot.slane %v684_v34, %v292_v40  ;;  %v212_v54 = vld [vmem:[#allocation2] sm:$0x3] }
  0x20   : > { %v811_v27 = vld [vmem:[%s910_s24 + $0x30] sm:$0xff]   ;;  %v815_v32 = vld [vmem:[%s910_s24 + $0x38] sm:$0xff]   ;;  %v587_v60 = vld [vmem:[%s982_s2] sm:$0x3] (!%p717_p6) }
  0x21   : > { %728 = vmatpush3.bf16.msra.mxu0 %v795_v11  ;;  %v812_v28 = vld [vmem:[%s910_s24 + $0xb0] sm:$0xff]   ;;  %v816_v33 = vld [vmem:[%s910_s24 + $0xb8] sm:$0xff]   ;;  %v300_v41 = vrot.slane %v286_v38, %v292_v40  ;;  %v301_v44 = vcombine.high %v293_v42, %v293_v42 }
  0x22   : > { %750 = vmatpush3.bf16.msra.mxu1 %v796_v12  ;;  %729 = vmatprep.subr.bf16.mxu0 %v797_v13 }
  0x23   : > { %751 = vmatprep.subr.bf16.mxu1 %v798_v14  ;;  %531 = vmatprep.mubr.bf16.mxu0 %v300_v41  ;;  %v302_v43 = vcombine.high %v300_v41, %v300_v41 }
  0x25   : > { %730 = vmatpush3.bf16.msra.mxu0 %v799_v15  ;;  %571 = vmatprep.mubr.bf16.mxu1 %v302_v43 }
  0x26   : > { %752 = vmatpush3.bf16.msra.mxu1 %v800_v16  ;;  %731 = vmatprep.subr.bf16.mxu0 %v801_v17 }
  0x27   : > { %753 = vmatprep.subr.bf16.mxu1 %v802_v18 }
  0x29   : > { %732 = vmatpush3.bf16.msra.mxu0 %v803_v19 }
  0x2a   : > { %754 = vmatpush3.bf16.msra.mxu1 %v804_v20  ;;  %733 = vmatprep.subr.bf16.mxu0 %v805_v21 }
  0x2b   : > { %755 = vmatprep.subr.bf16.mxu1 %v806_v22 }
  0x2d   : > { %734 = vmatpush3.bf16.msra.mxu0 %v807_v23 }
  0x2e   : > { %756 = vmatpush3.bf16.msra.mxu1 %v808_v24  ;;  %735 = vmatprep.subr.bf16.mxu0 %v809_v25 }
  0x2f   : > { %757 = vmatprep.subr.bf16.mxu1 %v810_v26 }
  0x31   : > { %736 = vmatpush3.bf16.msra.mxu0 %v811_v27 }
  0x32   : > { %758 = vmatpush3.bf16.msra.mxu1 %v812_v28  ;;  %737 = vmatprep.subr.bf16.mxu0 %v813_v29 }
  0x33   : > { %759 = vmatprep.subr.bf16.mxu1 %v814_v30 }
  0x35   : > { %738 = vmatpush3.bf16.msra.mxu0 %v815_v32 }
  0x36   : > { %760 = vmatpush3.bf16.msra.mxu1 %v816_v33 }
  0x38   : > { %532 = vmatmul.mubr.bf16.vlgmr.msra.gmra.mrb[0].mxu0 %v293_v42 }
  0x39   : > { %572 = vmatmul.mubr.bf16.vlgmr.msra.gmra.mrb[0].mxu1 %v301_v44 }
 0x10b   : > { %v739_v45 = vpop.f32.mrb[0].mxu0 }
 0x10c   : > { %v740_v46 = vpop.f32.mrb[1].mxu0  ;;  %v761_v47 = vpop.f32.mrb[0].mxu1 }
 0x10d   : > { %v741_v48 = vadd.f32 %v740_v46, %v739_v45  ;;  %v742_v49 = vpop.f32.mrb[2].mxu0  ;;  %v762_v50 = vpop.f32.mrb[1].mxu1 }
 0x10e   : > { %v743_v51 = vpop.f32.mrb[3].mxu0  ;;  %v763_v52 = vadd.f32 %v762_v50, %v761_v47  ;;  %v764_v53 = vpop.f32.mrb[2].mxu1  ;;  %585 = sbr.rel (%p717_p6) target bundleno = 750 (0x2ee), region = 44 }
 0x10f   : > { %v765_v55 = vpop.f32.mrb[3].mxu1 }
 0x110   : > { %v574_v56 = vadd.f32 %v763_v52, %v741_v48 }
 0x112   : > { %v579_v57 = vadd.f32 %v574_v56, %v212_v54 }
 0x114   : > { %581 = vst.msk [vmem:[#allocation2] sm:$0x3] %vm580_vm1, %v579_v57 }
 0x11b   : > { %v586_v58 = vld [vmem:[#allocation2] sm:$0x3] }
 0x11c   : > { %590 = vperm.xlu0 %817, %v586_v58  }
 0x19b   : > { %v591_v61 = vpop.permute.xlu0 %590 }
 0x19c   : > { %v593_v62 = vadd.f32 %v591_v61, %v587_v60 }
 0x19e   : > { %v595_v63 = vsel %vm594_vm2, %v593_v62, -inf }
 0x19f   : > { %596 = vmax.xlane.f32.xlu0 %v595_v63 }
 0x22c   : > { %v597_v0 = vpop.xlane.xlu0 %596 }
 0x22d   : > { %v598_v1 = vsub.f32 %v593_v62, %v597_v0 }
 0x22f   : > { %v599_v2 = vmul.f32 1.442695, %v598_v1 }
 0x231   : > { %818 = vpow2.f32 %v599_v2 }
 0x23b   : > { %v819_v3 = vpop.eup %818 }
 0x23c   : > { %v601_v4 = vsel %vm594_vm2, %v819_v3, 0.0 }
 0x23d   : > { %602 = vadd.xlane.f32.xlu1 %v601_v4 }
 0x2ca   : > { %v603_v5 = vpop.xlane.xlu1 %602 }
 0x2cb   : > { %820 = vlog2.f32 %v603_v5 }
 0x2d5   : > { %v821_v6 = vpop.eup %820 }
 0x2d6   : > { %v605_v7 = vmul.f32 0.6931472, %v821_v6 }
 0x2d8   : > { %v606_v8 = vadd.f32 %v605_v7, %v597_v0 }
 0x2da   : > { %v718_v9 = vadd.f32 -1.609438, %v606_v8 }
 0x2dc   : > { %v608_v10 = vsub.f32 0.0, %v718_v9 }
 0x2de   : > { %v610_v11 = vsel %vm609_vm3, %v608_v10, 0.0 }
 0x2df   : > { %v611_v12 = vrot.slane %v610_v11, 4 }
 0x2e1   : > { %v612_v13 = vadd.f32 %v611_v12, %v610_v11 }
 0x2e3   : > { %v613_v14 = vrot.slane %v612_v13, 2 }
 0x2e5   : > { %v614_v15 = vadd.f32 %v613_v14, %v612_v13 }
 0x2e7   : > { %v615_v16 = vrot.slane %v614_v15, 1 }
 0x2e9   : > { %v616_v17 = vadd.f32 %v615_v16, %v614_v15 }
 0x2eb   : > { %v618_v18 = vmul.f32 0.5, %v616_v17 }
 0x2ed   : > { %620 = vst.msk [vmem:[#allocation3] sm:$0x1] %vm619_vm4, %v618_v18 }
 0x2ee PF: > { %p771_p7 = scmp.eq.s32.totalorder %s895_s16, 1  ;;  %s863_s29 = smov [#allocation3]  }
 0x2ef   : > { %s628_s30 = sshll.u32 %s863_s29, 4  ;;  %s629_s30 = int_to_ptr.vmem [resolvable:$true] %s628_s30 }
 0x2f0   : > { %s822_s5 = scalar_lea.vmem %s629_s30, 16  ;;  %s828_s6 = scalar_lea.vmem %s629_s30, 32 }
 0x2f1   : > { %p823_p8 = scmp.ne.s32.totalorder %s629_s30, %s822_s5  ;;  %p829_p11 = scmp.lt.s32.totalorder %s629_s30, %s629_s30 }
 0x2f2   : > { %p830_p12 = scmp.lt.s32.totalorder %s828_s6, %s822_s5 }
 0x2f3   : > { %p824_p9 = pnand %p823_p8, %p771_p7 }
 0x2f4   : > { %p831_p13 = por %p830_p12, %p829_p11 }
 0x2f5   : > { %p825_p10 = pneg %p824_p9 }
 0x2f7   : > { %p832_p0 = pnand %p831_p13, %p825_p10 }
 0x2f9   : > { %835 = shalt.err (!%p832_p0)
}
 0x2fa   : > { %s836_s9 = scalar_lea.hbm %s984_s4, 16 }
 0x2fb   : > { %p837_p1 = scmp.ne.s32.totalorder %s984_s4, %s836_s9  ;;  %p842_p4 = scmp.lt.u32.totalorder %s836_s9, %s984_s4 }
 0x2fd   : > { %p838_p2 = pnand %p837_p1, %p771_p7 }
 0x2ff   : > { %p839_p3 = pneg %p838_p2 }
 0x301   : > { %p844_p5 = pnand %p842_p4, %p839_p3 }
 0x303   : > { %847 = shalt.err (!%p844_p5)
}
 0x304   : > { %768 = dma.vmem_to_hbm [thread:$0]  (%p771_p7), %s629_s30, 16, %s984_s4, [#allocation4]  }
 0x305   : > { %853 = dma.done.wait (%p771_p7), [#allocation4], 16  }
 0x306   : > { %855 = vsyncadd (%p771_p7), [#allocation4], 4294967280 }
 0x307 PF: > { %s15_s15 = sadd.s32 1, %s858_s15  }
 0x308   : > { %p12_p6 = scmp.ge.s32.totalorder %s15_s15, 4  }
 0x30a   :  { %14 = sbr.rel (!%p12_p6) target bundleno = 1 (0x1), region = 74 }
 0x311   :  { %641 = vsyncpa [#allocation4], 1 }
 0x312   :  { %643 = vsyncpa [#allocation4 + $0x1], 1 }

</bundles_post_ra>
